<compile_context>
chip_gen: v6e
topology: v6e:2x2x1
jax: 0.10.0
libtpu: 0.0.40
codegen_flags: <defaults>
</compile_context>

<pallas_src>
import jax
import jax.numpy as jnp
from jax.experimental import pallas as pl
from jax.experimental.pallas import tpu as pltpu

IN_FEATURES = 2
OUT_FEATURES = 1

_LANES = 128
_TILE_CANDIDATES = (2048, 1024, 512, 256, 128)  # largest divisor of padded B wins


def perceptron_kernel(wb_ref, x_ref, o_ref):
    # wb_ref: (3,)   f32 in SMEM  -> [w0, w1, bias]  (whole array, untiled)
    # x_ref : (2, T) f32 in VMEM  -> feature-major, lane-dense batch tile
    # o_ref : (1, T) f32 in VMEM  -> lane-dense output tile
    w0 = wb_ref[0]
    w1 = wb_ref[1]
    b = wb_ref[2]

    x0 = x_ref[0:1, :]  # (1, T) full-lane row
    x1 = x_ref[1:2, :]  # (1, T) full-lane row
    # VPU dot for K=2, N=1: two scalar-broadcast FMAs. No MXU (would be ~1.5%
    # utilized and add a weight DMA + push/pop latency for zero benefit).
    y = x0 * w0 + x1 * w1 + b

    # sigmoid(y) = 1 / (1 + exp(-y)): exp on the EUP, reciprocal kept on the
    # EUP slot via pl.reciprocal(approx=True) instead of a VALU divide.
    e = jnp.exp(-y)
    o_ref[...] = pl.reciprocal(1.0 + e, approx=True).astype(o_ref.dtype)


def pack_params(weight, bias):
    """weight: (1, 2) f32 (torch nn.Linear layout); bias: (1,) f32 -> flat (3,)."""
    assert weight.shape == (OUT_FEATURES, IN_FEATURES)
    assert bias.shape == (OUT_FEATURES,)
    return jnp.concatenate(
        [weight.reshape(-1), bias.reshape(-1)]
    ).astype(jnp.float32)


def _choose_tile(b_pad):
    for t in _TILE_CANDIDATES:
        if b_pad % t == 0:
            return t
    return _LANES  # unreachable: b_pad is always a multiple of 128


@jax.jit
def perceptron_forward(x, wb):
    """x: (B, 2) f32; wb: (3,) f32 packed [w0, w1, b]. Returns sigmoid(x @ W.T + b)."""
    batch, in_features = x.shape
    assert in_features == IN_FEATURES, in_features

    # Layout plumbing (wrapper side): feature-major (2, B) input / (1, B)
    # output, batch padded up to a multiple of 128 lanes.
    b_pad = ((batch + _LANES - 1) // _LANES) * _LANES
    tile = _choose_tile(b_pad)
    n_tiles = b_pad // tile

    x_t = x.astype(jnp.float32).T  # (2, B)
    if b_pad != batch:
        x_t = jnp.pad(x_t, ((0, 0), (0, b_pad - batch)))

    y = pl.pallas_call(
        perceptron_kernel,
        out_shape=jax.ShapeDtypeStruct((OUT_FEATURES, b_pad), jnp.float32),
        grid=(n_tiles,),
        in_specs=[
            # Tiny packed weight+bias vector: whole array in SMEM (scalar reads).
            pl.BlockSpec(memory_space=pltpu.MemorySpace.SMEM),
            # Feature-major input, lane-dense batch tiles. Sublane dim (2)
            # equals the full array dim, lane dim is a multiple of 128.
            pl.BlockSpec((IN_FEATURES, tile), lambda i: (0, i)),
        ],
        out_specs=pl.BlockSpec((OUT_FEATURES, tile), lambda i: (0, i)),
        compiler_params=pltpu.CompilerParams(
            dimension_semantics=("parallel",),   # shards grid across TCs on v7x
            vmem_limit_bytes=32 * 1024 * 1024,   # tiles are KB-scale; safe on all gens
        ),
    )(wb, x_t)

    # Back to the PyTorch (B, 1) contract.
    return y[0, :batch].reshape(batch, OUT_FEATURES)


if __name__ == "__main__":
    key = jax.random.PRNGKey(0)
    kw, kb, kx, kx2 = jax.random.split(key, 4)

    # Deterministic init mimicking torch.nn.Linear default: U(-1/sqrt(in), 1/sqrt(in))
    bound = 1.0 / jnp.sqrt(float(IN_FEATURES))
    weight = jax.random.uniform(
        kw, (OUT_FEATURES, IN_FEATURES), jnp.float32, -bound, bound
    )
    bias = jax.random.uniform(kb, (OUT_FEATURES,), jnp.float32, -bound, bound)

    # Pack params once (hoisted out of the forward hot path).
    wb = pack_params(weight, bias)

    # Tolerance accounts for the EUP approximate reciprocal in the sigmoid.
    TOL = 2e-3

    # Same input as the reference module: x = [[0.0, 1.0]]
    x = jnp.array([[0.0, 1.0]], dtype=jnp.float32)
    out = jax.block_until_ready(perceptron_forward(x, wb))
    ref = jax.nn.sigmoid(x @ weight.T + bias)
    assert out.shape == (1, 1), out.shape
    assert jnp.allclose(out, ref, atol=TOL), (out, ref)

    # Small random batch to exercise batch broadcasting.
    x2 = jax.random.normal(kx, (8, IN_FEATURES), jnp.float32)
    out2 = jax.block_until_ready(perceptron_forward(x2, wb))
    ref2 = jax.nn.sigmoid(x2 @ weight.T + bias)
    assert out2.shape == (8, 1), out2.shape
    assert jnp.allclose(out2, ref2, atol=TOL), (out2, ref2)

    # Non-multiple-of-128 batch to exercise padding + multi-step grid.
    x3 = jax.random.normal(kx2, (300, IN_FEATURES), jnp.float32)
    out3 = jax.block_until_ready(perceptron_forward(x3, wb))
    ref3 = jax.nn.sigmoid(x3 @ weight.T + bias)
    assert out3.shape == (300, 1), out3.shape
    assert jnp.allclose(out3, ref3, atol=TOL), (out3, ref3)

    print("KERNEL_OK")
</pallas_src>

<mosaic_0001>
module attributes {stable_mosaic.version = 11 : i64} {
  func.func @perceptron_kernel(%arg0: i32, %arg1: memref<3xf32, #tpu.memory_space<smem>>, %arg2: memref<2x128xf32, #tpu.memory_space<vmem>>, %arg3: memref<1x128xf32, #tpu.memory_space<vmem>>) attributes {dimension_semantics = [#tpu.dimension_semantics<parallel>], iteration_bounds = array<i64: 1>, scalar_prefetch = 0 : i64, scratch_operands = 0 : i64, tpu.core_type = #tpu.core_type<tc>, window_params = [{transform_indices = @transform_0, window_bounds = array<i64: 3>}, {transform_indices = @transform_1, window_bounds = array<i64: 2, 128>}, {transform_indices = @transform_2, window_bounds = array<i64: 1, 128>}]} {
    %c0 = arith.constant 0 : index
    %0 = memref.load %arg1[%c0] : memref<3xf32, #tpu.memory_space<smem>>
    %c1 = arith.constant 1 : index
    %1 = memref.load %arg1[%c1] : memref<3xf32, #tpu.memory_space<smem>>
    %c2 = arith.constant 2 : index
    %2 = memref.load %arg1[%c2] : memref<3xf32, #tpu.memory_space<smem>>
    %c0_0 = arith.constant 0 : index
    %c0_1 = arith.constant 0 : index
    %3 = vector.load %arg2[%c0_0, %c0_1] : memref<2x128xf32, #tpu.memory_space<vmem>>, vector<1x128xf32>
    %c1_2 = arith.constant 1 : index
    %c0_3 = arith.constant 0 : index
    %4 = vector.load %arg2[%c1_2, %c0_3] : memref<2x128xf32, #tpu.memory_space<vmem>>, vector<1x128xf32>
    %5 = vector.broadcast %0 : f32 to vector<1x128xf32>
    %6 = arith.mulf %3, %5 : vector<1x128xf32>
    %7 = vector.broadcast %1 : f32 to vector<1x128xf32>
    %8 = arith.mulf %4, %7 : vector<1x128xf32>
    %9 = arith.addf %6, %8 : vector<1x128xf32>
    %10 = vector.broadcast %2 : f32 to vector<1x128xf32>
    %11 = arith.addf %9, %10 : vector<1x128xf32>
    %cst = arith.constant 0.000000e+00 : f32
    %12 = vector.broadcast %cst : f32 to vector<1x128xf32>
    %13 = arith.subf %12, %11 : vector<1x128xf32>
    %14 = math.exp %13 : vector<1x128xf32>
    %cst_4 = arith.constant 1.000000e+00 : f32
    %15 = vector.broadcast %cst_4 : f32 to vector<1x128xf32>
    %16 = arith.addf %15, %14 : vector<1x128xf32>
    %17 = tpu.reciprocal %16 {approx = true} : vector<1x128xf32> -> vector<1x128xf32>
    %c0_5 = arith.constant 0 : index
    %c0_6 = arith.constant 0 : index
    %18 = vector.load %arg3[%c0_5, %c0_6] : memref<1x128xf32, #tpu.memory_space<vmem>>, vector<1x128xf32>
    tpu.vector_store %arg3[%c0_5, %c0_6], %17 {strides = array<i32>} : memref<1x128xf32, #tpu.memory_space<vmem>>, vector<1x128xf32>,
    return
  }
  func.func @transform_0(%arg0: i32) -> i32 {
    %c0_i32 = arith.constant 0 : i32
    %c0_i32_0 = arith.constant 0 : i32
    return %c0_i32 : i32
  }
  func.func @transform_1(%arg0: i32) -> (i32, i32) {
    %c0_i32 = arith.constant 0 : i32
    %c0_i32_0 = arith.constant 0 : i32
    return %c0_i32, %arg0 : i32, i32
  }
  func.func @transform_2(%arg0: i32) -> (i32, i32) {
    %c0_i32 = arith.constant 0 : i32
    %c0_i32_0 = arith.constant 0 : i32
    return %c0_i32, %arg0 : i32, i32
  }
}

</mosaic_0001>

<bundles_post_ra>
// kernel: perceptron_forward.1
= control target key start
LH: loop header
LB: loop body
LE: loop exit
PB: predicated region body
PF: predicated region fallthrough
CT: control target
= control target key end

     0   :  { %7 = vsyncpa [#allocation4], 0  ;;  %s131_s0 = inlined_call_operand.vmem [shape: f32[3], index: 0, kind: input, shape index: {}]   ;;  %s132_s1 = inlined_call_operand.vmem [shape: f32[2,128], index: 1, kind: input, shape index: {}]   ;;  %s133_s2 = inlined_call_operand.hbm [shape: f32[1,128], index: 2, kind: output, shape index: {}]  }
   0x1   :  { %8 = vsyncpa [#allocation3], 0  ;;  %s15_s11 = sshll.u32 %s131_s0, 4  ;;  %s16_s11 = int_to_ptr.vmem [resolvable:$true] %s15_s11 }
   0x2   :  { %s66_s12 = scalar_lea.vmem %s16_s11, 16  ;;  %p71_p1 = scmp.lt.s32.totalorder %s16_s11, %s16_s11 }
   0x3   :  { %p67_p0 = scmp.ne.s32.totalorder %s16_s11, %s66_s12  ;;  %p72_p2 = scmp.lt.s32.totalorder %s66_s12, %s66_s12 }
   0x5   :  { %p73_p3 = por %p72_p2, %p71_p1 }
   0x7   :  { %p74_p4 = pnand %p73_p3, %p67_p0 }
   0x9   :  { %77 = shalt.err (!%p74_p4)
}
   0xa   :  { %s102_s13 = smov [#allocation2]  }
   0xb   :  { %18 = dma.vmem_to_smem %s16_s11, 16, %s102_s13, [#allocation4]  }
   0xc   :  { %98 = dma.done.wait [#allocation4], 16  }
   0xd   :  { %99 = vsyncadd [#allocation4], 4294967280 }
   0xe   :  { %24 = sfence }
   0xf   :  { %s25_s14 = sld [smem:[#allocation2]]  ;;  %v28_v0 = vld [vmem:[%s132_s1] sm:$0x1]  ;;  %v29_v1 = vld [vmem:[%s132_s1 + $0x1] sm:$0x1]  ;;  %s103_s20 = smov [#allocation5]  }
  0x10   :  { %s58_s15 = sld [smem:[#allocation2 + $0x1]]  ;;  %s49_s21 = sshll.u32 %s103_s20, 4  ;;  %s50_s21 = int_to_ptr.vmem [resolvable:$true] %s49_s21 }
  0x11   :  { %s59_s16 = sld [smem:[#allocation2 + $0x2]]  ;;  %s78_s22 = scalar_lea.vmem %s50_s21, 16 }
  0x12   :  { %p79_p5 = scmp.ne.s32.totalorder %s50_s21, %s78_s22  ;;  %s82_s1 = scalar_lea.vmem %s50_s21, 32 }
  0x13   :  { %p83_p6 = scmp.lt.s32.totalorder %s50_s21, %s50_s21  ;;  %p84_p7 = scmp.lt.s32.totalorder %s82_s1, %s78_s22 }
  0x15   :  { %v30_v2 = vstv %s25_s14  ;;  %p85_p8 = por %p84_p7, %p83_p6 }
  0x16   :  { %v31_v3 = vmul.f32 %v30_v2, %v28_v0  ;;  %v32_v4 = vstv %s58_s15 }
  0x17   :  { %v33_v5 = vmul.f32 %v32_v4, %v29_v1  ;;  %v35_v6 = vstv %s59_s16  ;;  %p86_p9 = pnand %p85_p8, %p79_p5 }
  0x19   :  { %v34_v7 = vadd.f32 %v33_v5, %v31_v3 }
  0x1b   :  { %v36_v8 = vadd.f32 %v35_v6, %v34_v7 }
  0x1d   :  { %v37_v9 = vsub.f32 0.0, %v36_v8 }
  0x1f   :  { %v38_v10 = vmul.f32 1.442695, %v37_v9 }
  0x21   :  { %62 = vpow2.f32 %v38_v10 }
  0x2e   :  { %v63_v11 = vpop.eup %62 }
  0x2f   :  { %v40_v12 = vadd.f32 1.0, %v63_v11 }
  0x31   :  { %64 = vrcp.f32 %v40_v12 }
  0x3e   :  { %v65_v13 = vpop.eup %64 }
  0x3f   :  { %42 = vst [vmem:[#allocation5] sm:$0x1] %v65_v13 }
  0x40   :  { %89 = shalt.err (!%p86_p9)
}
  0x41   :  { %52 = dma.vmem_to_hbm [thread:$0]  %s50_s21, 16, %s133_s2, [#allocation3]  }
  0x42   :  { %100 = dma.done.wait [#allocation3], 16  }
  0x43   :  { %101 = vsyncadd [#allocation3], 4294967280 }
  0x44   :  { %56 = vsyncpa [#allocation3], 1 }
  0x45   :  { %57 = vsyncpa [#allocation4], 1 }

</bundles_post_ra>
